<compile_context>
chip_gen: v5e
topology: v5e:2x2
jax: 0.10.0
libtpu: 0.0.40
codegen_flags: <defaults>
</compile_context>

<pallas_src>
import functools

import jax
import jax.numpy as jnp
from jax import lax
from jax.experimental import pallas as pl
from jax.experimental.pallas import tpu as pltpu

_EPS = 1e-8                      # torch cosine_similarity default eps
_NEG_BIG = -1e9                  # mask value for padded logit columns


def _round_up(x, m):
    return ((x + m - 1) // m) * m


def _tpu_budgets():
    """Generation-dependent VMEM budget / tile caps."""
    vmem_bytes = 64 * 1024 * 1024
    try:
        info = pltpu.get_tpu_info()
        vmem_bytes = int(getattr(info, "vmem_capacity_bytes", vmem_bytes))
    except Exception:
        pass
    if vmem_bytes >= 100 * 1024 * 1024:
        # v5e / v6e: 128 MiB VMEM — large tiles, high scoped limit.
        return dict(vmem_limit=100 * 1024 * 1024,
                    input_budget=64 * 1024 * 1024,
                    tile_t_cap=2048, tile_m_cap=1024)
    # v7x: 64 MiB VMEM per TensorCore — conservative tiles / limit.
    return dict(vmem_limit=44 * 1024 * 1024,
                input_budget=24 * 1024 * 1024,
                tile_t_cap=1024, tile_m_cap=512)


# ---------------------------------------------------------------------------
# Kernel A: per-layer L1 reconstruction loss + (-logsigmoid(cosine)) loss.
# Grid = (N layers [parallel], T tiles [arbitrary]); block = (B, 1, tile_t, D).
# Partial row sums accumulate in (B, tile_t, 1) VMEM scratch; the per-layer
# means are written once per layer into a lane-dense (1, 8, 128) output block
# (race-free across the parallel N axis).
# ---------------------------------------------------------------------------
def _rec_sim_kernel(pred_ref, tgt_ref, rec_out_ref, sim_out_ref,
                    rec_acc_ref, sim_acc_ref, *,
                    b_total, t_total, d_total, tile_t, has_pad):
    ti = pl.program_id(1)
    is_first = ti == 0
    is_last = ti == pl.num_programs(1) - 1

    @pl.when(is_first)
    def _():
        rec_acc_ref[...] = jnp.zeros_like(rec_acc_ref)
        sim_acc_ref[...] = jnp.zeros_like(sim_acc_ref)

    p = pred_ref[...].astype(jnp.float32)     # (B, TILE_T, D)
    t = tgt_ref[...].astype(jnp.float32)

    if has_pad:
        rows = ti * tile_t + lax.broadcasted_iota(jnp.int32, (1, tile_t, 1), 1)
        valid = rows < t_total                # (1, TILE_T, 1)
    else:
        valid = None

    # --- L1 partial: per-row D-axis reduce (XLU), accumulate in VMEM ---------
    diff = jnp.abs(p - t)                     # (B, TILE_T, D)
    if valid is not None:
        diff = jnp.where(valid, diff, 0.0)
    rec_acc_ref[...] += jnp.sum(diff, axis=-1, keepdims=True)

    # --- cosine along D -> -logsigmoid(cos) per-row partial ------------------
    w12 = jnp.sum(p * t, axis=-1, keepdims=True)   # (B, TILE_T, 1)
    w1 = jnp.sum(p * p, axis=-1, keepdims=True)
    w2 = jnp.sum(t * t, axis=-1, keepdims=True)
    cos = w12 * lax.rsqrt(jnp.maximum(w1 * w2, _EPS * _EPS))
    sim = jnp.log1p(jnp.exp(-cos))                 # softplus(-cos), cos in [-1,1]
    if valid is not None:
        sim = jnp.where(valid, sim, 0.0)
    sim_acc_ref[...] += sim

    @pl.when(is_last)
    def _():
        rec_mean = jnp.sum(rec_acc_ref[...]) * jnp.float32(
            1.0 / (b_total * t_total * d_total))
        sim_mean = jnp.sum(sim_acc_ref[...]) * jnp.float32(
            1.0 / (b_total * t_total))
        rec_out_ref[...] = jnp.broadcast_to(rec_mean, rec_out_ref.shape)
        sim_out_ref[...] = jnp.broadcast_to(sim_mean, sim_out_ref.shape)


def rec_sim_layer_losses(pred, target):
    B, N, T, D = pred.shape
    budgets = _tpu_budgets()

    # bf16 at the HBM boundary — Kernel A is HBM-bandwidth bound.
    pred_bf = pred.astype(jnp.bfloat16)
    target_bf = target.astype(jnp.bfloat16)

    # Size tile_t so 2 inputs x 2 pipeline buffers of (B, tile_t, D) bf16 fit.
    bytes_per_row = 2 * 2 * B * D * 2
    tile_fit = max(8, (budgets["input_budget"] // bytes_per_row) // 8 * 8)
    tile_t = int(min(budgets["tile_t_cap"], _round_up(T, 8), tile_fit))
    num_t = pl.cdiv(T, tile_t)
    has_pad = (num_t * tile_t) != T

    kernel = functools.partial(
        _rec_sim_kernel, b_total=B, t_total=T, d_total=D,
        tile_t=tile_t, has_pad=has_pad)

    cost = pl.CostEstimate(
        flops=int(10 * B * N * T * D),
        transcendentals=int(3 * B * N * T),
        bytes_accessed=int(2 * B * N * T * D * 2 + 2 * N * 8 * 128 * 4))

    rec_out, sim_out = pl.pallas_call(
        kernel,
        grid=(N, num_t),
        in_specs=[
            pl.BlockSpec((B, None, tile_t, D), lambda n, t: (0, n, t, 0)),
            pl.BlockSpec((B, None, tile_t, D), lambda n, t: (0, n, t, 0)),
        ],
        out_specs=[
            pl.BlockSpec((1, 8, 128), lambda n, t: (n, 0, 0)),
            pl.BlockSpec((1, 8, 128), lambda n, t: (n, 0, 0)),
        ],
        out_shape=[
            jax.ShapeDtypeStruct((N, 8, 128), jnp.float32),
            jax.ShapeDtypeStruct((N, 8, 128), jnp.float32),
        ],
        scratch_shapes=[
            pltpu.VMEM((B, tile_t, 1), jnp.float32),   # L1 per-row partial sums
            pltpu.VMEM((B, tile_t, 1), jnp.float32),   # sim per-row partial sums
        ],
        compiler_params=pltpu.CompilerParams(
            dimension_semantics=("parallel", "arbitrary"),
            vmem_limit_bytes=budgets["vmem_limit"]),
        cost_estimate=cost,
    )(pred_bf, target_bf)
    return rec_out[:, 0, 0], sim_out[:, 0, 0]


# ---------------------------------------------------------------------------
# Kernel B: embedding KL loss ('type1' projection).
#   cos(embeddings, label_embs) [/ temperature] -> log_softmax ->
#   F.kl_div(student_log, teacher_log, log_target=True, reduction='batchmean')
# Tiled over M = B*T rows; label matrix (bf16) and its precomputed norms (wl)
# resident; per-tile partial KL sums emitted as lane-dense (1,8,128) blocks.
# Per-row KL is computed without materializing p_t / t_log / s_log / kl_terms:
#   sum(p_t * t_log) = sum(e_t * z_t)/denom_t - log denom_t
#   sum(p_t * s_log) = sum(e_t * z_s)/denom_t - log denom_s
# ---------------------------------------------------------------------------
def _emb_kl_kernel(temb_ref, semb_ref, lab_ref, wl_ref, out_ref, *,
                   inv_temperature, use_temperature,
                   c_valid, c_pad, m_valid, tile_m, has_row_pad):
    L = lab_ref[...]                          # (C_pad, E) bf16, resident
    wl = wl_ref[...]                          # (1, C_pad) f32, resident
    col_valid = lax.broadcasted_iota(jnp.int32, (1, c_pad), 1) < c_valid

    def cos_logits(x_ref):
        x = x_ref[...]                        # (TILE_M, E) bf16 — MXU operand as-is
        dots = lax.dot_general(x, L, (((1,), (1,)), ((), ())),
                               preferred_element_type=jnp.float32)
        xf = x.astype(jnp.float32)
        wx = jnp.sum(xf * xf, axis=-1, keepdims=True)          # (TILE_M, 1)
        return dots * lax.rsqrt(jnp.maximum(wx * wl, _EPS * _EPS))

    t_logits = cos_logits(temb_ref) * jnp.float32(inv_temperature)
    s_logits = cos_logits(semb_ref)
    if use_temperature:
        s_logits = s_logits * jnp.float32(inv_temperature)

    # Mask padded label columns before softmax (exp underflows to exactly 0).
    neg = jnp.float32(_NEG_BIG)
    t_logits = jnp.where(col_valid, t_logits, neg)
    s_logits = jnp.where(col_valid, s_logits, neg)

    # Teacher softmax: single exp pass.
    m_t = jnp.max(t_logits, axis=-1, keepdims=True)
    z_t = t_logits - m_t
    e_t = jnp.exp(z_t)                        # exactly 0 at masked columns
    denom_t = jnp.sum(e_t, axis=-1, keepdims=True)
    log_denom_t = jnp.log(denom_t)

    # Student log_softmax denominator.
    m_s = jnp.max(s_logits, axis=-1, keepdims=True)
    z_s = s_logits - m_s
    log_denom_s = jnp.log(jnp.sum(jnp.exp(z_s), axis=-1, keepdims=True))

    sum_pt_zt = jnp.sum(e_t * z_t, axis=-1, keepdims=True)
    sum_pt_zs = jnp.sum(e_t * z_s, axis=-1, keepdims=True)
    kl_row = (sum_pt_zt - sum_pt_zs) / denom_t - log_denom_t + log_denom_s

    if has_row_pad:
        rows = pl.program_id(0) * tile_m + lax.broadcasted_iota(
            jnp.int32, (tile_m, 1), 0)
        kl_row = jnp.where(rows < m_valid, kl_row, 0.0)

    out_ref[...] = jnp.broadcast_to(jnp.sum(kl_row), out_ref.shape)


def emb_kl_loss(teacher_emb_flat, student_emb_flat, label_embs,
                temperature, use_temperature):
    M, E = teacher_emb_flat.shape
    C = label_embs.shape[0]
    c_pad = _round_up(C, 128)
    budgets = _tpu_budgets()

    label_f32 = label_embs.astype(jnp.float32)
    if c_pad != C:
        label_f32 = jnp.pad(label_f32, ((0, c_pad - C), (0, 0)))
    wl = jnp.sum(label_f32 * label_f32, axis=-1)[None, :]   # (1, c_pad) f32, hoisted
    label_bf = label_f32.astype(jnp.bfloat16)

    t_bf = teacher_emb_flat.astype(jnp.bfloat16)
    s_bf = student_emb_flat.astype(jnp.bfloat16)

    # Size tile_m so double-buffered bf16 inputs + resident label + ~5 live
    # (tile_m, c_pad) f32 intermediates fit the generation's budget.
    resident = c_pad * E * 2 + c_pad * 4
    per_row = 2 * 2 * E * 2 + 5 * c_pad * 4
    fit = max(8, int(max(budgets["input_budget"] - resident, per_row * 8))
              // per_row // 8 * 8)
    tile_m = int(min(budgets["tile_m_cap"], _round_up(M, 8), fit))
    num_m = pl.cdiv(M, tile_m)
    has_row_pad = (num_m * tile_m) != M

    kernel = functools.partial(
        _emb_kl_kernel,
        inv_temperature=1.0 / temperature, use_temperature=use_temperature,
        c_valid=C, c_pad=c_pad, m_valid=M, tile_m=tile_m,
        has_row_pad=has_row_pad)

    cost = pl.CostEstimate(
        flops=int(2 * 2 * M * E * c_pad + 12 * M * c_pad),
        transcendentals=int(2 * M * c_pad + 4 * M),
        bytes_accessed=int(2 * M * E * 2 + c_pad * E * 2 + c_pad * 4
                           + num_m * 8 * 128 * 4))

    partial = pl.pallas_call(
        kernel,
        grid=(num_m,),
        in_specs=[
            pl.BlockSpec((tile_m, E), lambda i: (i, 0)),
            pl.BlockSpec((tile_m, E), lambda i: (i, 0)),
            pl.BlockSpec((c_pad, E), lambda i: (0, 0)),   # resident label matrix
            pl.BlockSpec((1, c_pad), lambda i: (0, 0)),   # resident label norms
        ],
        out_specs=pl.BlockSpec((1, 8, 128), lambda i: (i, 0, 0)),
        out_shape=jax.ShapeDtypeStruct((num_m, 8, 128), jnp.float32),
        compiler_params=pltpu.CompilerParams(
            dimension_semantics=("parallel",),
            vmem_limit_bytes=budgets["vmem_limit"]),
        cost_estimate=cost,
    )(t_bf, s_bf, label_bf, wl)

    return jnp.sum(partial[:, 0, 0]) / M     # batchmean over true M rows


# ---------------------------------------------------------------------------
# DistillerForPretrain.compute_loss equivalent (config baked in; steps=0).
# ---------------------------------------------------------------------------
DISTILL_CFG = dict(
    loss_type="l1",
    rec_loss=1.0,
    cosine_loss=1.0,
    embedding_loss=1.0,
    frontend_loss=1.0,
    frontend_steps=0,        # steps(0) < frontend_steps(0) is False -> main losses
    temperature=0.1,
    use_temperature=True,
    projection_type="type1",
)


def distiller_for_pretrain_loss(feat, pred, target, teacher_frontend,
                                teacher_embeddings, student_embeddings,
                                label_embs, cfg=DISTILL_CFG, steps=0):
    assert pred.shape == target.shape, (pred.shape, target.shape)

    if steps < cfg["frontend_steps"]:
        # frontend warm-up phase (not hit with frontend_steps=0)
        frontend_loss = jnp.mean(jnp.abs(teacher_frontend - feat))
        zero = jnp.float32(0.0)
        total = frontend_loss * cfg["frontend_loss"]
        return total, zero, None, zero, None, zero, frontend_loss

    rec_layer_loss, sim_layer_loss = rec_sim_layer_losses(pred, target)
    rec_loss = jnp.mean(rec_layer_loss)      # == full mean (equal-sized layers)
    sim_loss = jnp.mean(sim_layer_loss)

    B, T, E = teacher_embeddings.shape
    t_flat = teacher_embeddings.reshape(B * T, E)
    s_flat = student_embeddings.reshape(B * T, E)
    emb_loss = emb_kl_loss(t_flat, s_flat, label_embs,
                           cfg["temperature"], cfg["use_temperature"])

    frontend_loss = jnp.float32(0.0)
    total_loss = (rec_loss * cfg["rec_loss"]
                  + sim_loss * cfg["cosine_loss"]
                  + emb_loss * cfg["embedding_loss"]
                  + frontend_loss * cfg["frontend_loss"])
    return total_loss, rec_loss, rec_layer_loss, sim_loss, sim_layer_loss, emb_loss, frontend_loss


# ---------------------------------------------------------------------------
# Pure-JAX reference for the correctness check (mirrors the kernels' numerics:
# bf16 inputs at the HBM boundary, bf16 MXU matmul with f32 accumulation,
# teacher logits always /T, student logits /T only when use_temperature).
# ---------------------------------------------------------------------------
def _reference(pred, target, t_emb, s_emb, label_embs, cfg=DISTILL_CFG):
    pred = pred.astype(jnp.bfloat16).astype(jnp.float32)
    target = target.astype(jnp.bfloat16).astype(jnp.float32)
    diff = jnp.abs(pred - target)
    rec_layer = diff.mean(axis=(0, 2, 3))
    rec = diff.mean()
    w12 = jnp.sum(pred * target, -1)
    den = jnp.sqrt(jnp.maximum(jnp.sum(pred * pred, -1) * jnp.sum(target * target, -1),
                               _EPS * _EPS))
    sim = jnp.log1p(jnp.exp(-(w12 / den)))
    sim_layer = sim.mean(axis=(0, 2))
    simm = sim.mean()

    B, T, E = t_emb.shape
    tf = t_emb.reshape(B * T, E).astype(jnp.bfloat16)
    sf = s_emb.reshape(B * T, E).astype(jnp.bfloat16)
    lab_f32 = label_embs.astype(jnp.float32)
    lab_bf = lab_f32.astype(jnp.bfloat16)
    wl = jnp.sum(lab_f32 * lab_f32, -1)[None, :]

    def logits(x_bf):
        d = jnp.dot(x_bf, lab_bf.T, preferred_element_type=jnp.float32)
        xf = x_bf.astype(jnp.float32)
        wx = jnp.sum(xf * xf, -1, keepdims=True)
        return d / jnp.sqrt(jnp.maximum(wx * wl, _EPS * _EPS))

    inv_temp = 1.0 / cfg["temperature"]
    tl = jax.nn.log_softmax(logits(tf) * inv_temp, axis=-1)
    s_logit = logits(sf)
    if cfg["use_temperature"]:
        s_logit = s_logit * inv_temp
    sl = jax.nn.log_softmax(s_logit, axis=-1)
    kl = jnp.sum(jnp.exp(tl) * (tl - sl)) / (B * T)
    total = rec * cfg["rec_loss"] + simm * cfg["cosine_loss"] + kl * cfg["embedding_loss"]
    return total, rec, rec_layer, simm, sim_layer, kl


if __name__ == "__main__":
    key = jax.random.PRNGKey(0)
    B, N, T, D = 2, 2, 8, 32     # batch, n_tasks (pred layers), frames, hidden dim
    E, C = 32, 16                # embedding dim, number of label embeddings

    k = jax.random.split(key, 7)
    pred = jax.random.normal(k[0], (B, N, T, D), jnp.float32)            # student predictions
    target = jax.random.normal(k[1], (B, N, T, D), jnp.float32)          # teacher hidden states
    feat = jax.random.normal(k[2], (B, T, D), jnp.float32)               # student frontend feat
    teacher_frontend = jax.random.normal(k[3], (B, T, D), jnp.float32)   # teacher hidden_states[0]
    teacher_embeddings = jax.random.normal(k[4], (B, T, E), jnp.float32)
    student_embeddings = jax.random.normal(k[5], (B, T, E), jnp.float32)
    label_embs = jax.random.normal(k[6], (C, E), jnp.float32)            # teacher.label_embs_concat

    outs = distiller_for_pretrain_loss(feat, pred, target, teacher_frontend,
                                       teacher_embeddings, student_embeddings,
                                       label_embs)
    outs = jax.block_until_ready(outs)
    total, rec, rec_layer, sim, sim_layer, emb, frontend = outs

    ref = _reference(pred, target, teacher_embeddings, student_embeddings, label_embs)
    import numpy as np
    np.testing.assert_allclose(np.asarray(total), np.asarray(ref[0]), rtol=2e-4, atol=2e-5)
    np.testing.assert_allclose(np.asarray(rec), np.asarray(ref[1]), rtol=2e-4, atol=2e-5)
    np.testing.assert_allclose(np.asarray(rec_layer), np.asarray(ref[2]), rtol=2e-4, atol=2e-5)
    np.testing.assert_allclose(np.asarray(sim), np.asarray(ref[3]), rtol=2e-4, atol=2e-5)
    np.testing.assert_allclose(np.asarray(sim_layer), np.asarray(ref[4]), rtol=2e-4, atol=2e-5)
    np.testing.assert_allclose(np.asarray(emb), np.asarray(ref[5]), rtol=2e-4, atol=2e-5)

    print("KERNEL_OK")
</pallas_src>

<mosaic_0001>
module attributes {stable_mosaic.version = 11 : i64} {
  func.func @_rec_sim_kernel(%arg0: i32, %arg1: i32, %arg2: memref<2x1x8x32xbf16, #tpu.memory_space<vmem>>, %arg3: memref<2x1x8x32xbf16, #tpu.memory_space<vmem>>, %arg4: memref<1x8x128xf32, #tpu.memory_space<vmem>>, %arg5: memref<1x8x128xf32, #tpu.memory_space<vmem>>, %arg6: memref<2x8x1xf32, #tpu.memory_space<vmem>>, %arg7: memref<2x8x1xf32, #tpu.memory_space<vmem>>) attributes {dimension_semantics = [#tpu.dimension_semantics<parallel>, #tpu.dimension_semantics<arbitrary>], iteration_bounds = array<i64: 2, 1>, scalar_prefetch = 0 : i64, scratch_operands = 2 : i64, tpu.core_type = #tpu.core_type<tc>, window_params = [{transform_indices = @transform_0, window_bounds = array<i64: 2, 1, 8, 32>}, {transform_indices = @transform_1, window_bounds = array<i64: 2, 1, 8, 32>}, {transform_indices = @transform_2, window_bounds = array<i64: 1, 8, 128>}, {transform_indices = @transform_3, window_bounds = array<i64: 1, 8, 128>}]} {
    %c0_i32 = arith.constant 0 : i32
    %0 = arith.cmpi eq, %arg1, %c0_i32 : i32
    %c0_i32_0 = arith.constant 0 : i32
    %1 = arith.cmpi eq, %arg1, %c0_i32_0 : i32
    %2 = arith.extui %0 : i1 to i32
    %c0_i32_1 = arith.constant 0 : i32
    %3 = arith.cmpi ne, %2, %c0_i32_1 : i32
    scf.if %3 {
      %cst_27 = arith.constant 0.000000e+00 : f32
      %40 = vector.broadcast %cst_27 : f32 to vector<2x8x1xf32>
      %c0_28 = arith.constant 0 : index
      %c0_29 = arith.constant 0 : index
      %c0_30 = arith.constant 0 : index
      %41 = vector.load %arg6[%c0_28, %c0_29, %c0_30] : memref<2x8x1xf32, #tpu.memory_space<vmem>>, vector<2x8x1xf32>
      tpu.vector_store %arg6[%c0_28, %c0_29, %c0_30], %40 {strides = array<i32>} : memref<2x8x1xf32, #tpu.memory_space<vmem>>, vector<2x8x1xf32>,
      %cst_31 = arith.constant 0.000000e+00 : f32
      %42 = vector.broadcast %cst_31 : f32 to vector<2x8x1xf32>
      %c0_32 = arith.constant 0 : index
      %c0_33 = arith.constant 0 : index
      %c0_34 = arith.constant 0 : index
      %43 = vector.load %arg7[%c0_32, %c0_33, %c0_34] : memref<2x8x1xf32, #tpu.memory_space<vmem>>, vector<2x8x1xf32>
      tpu.vector_store %arg7[%c0_32, %c0_33, %c0_34], %42 {strides = array<i32>} : memref<2x8x1xf32, #tpu.memory_space<vmem>>, vector<2x8x1xf32>,
    } else {
    }
    %c0 = arith.constant 0 : index
    %c0_2 = arith.constant 0 : index
    %c0_3 = arith.constant 0 : index
    %c0_4 = arith.constant 0 : index
    %4 = vector.load %arg2[%c0, %c0_2, %c0_3, %c0_4] : memref<2x1x8x32xbf16, #tpu.memory_space<vmem>>, vector<2x1x8x32xbf16>
    %5 = vector.shape_cast %4 : vector<2x1x8x32xbf16> to vector<2x8x32xbf16>
    %6 = arith.extf %5 : vector<2x8x32xbf16> to vector<2x8x32xf32>
    %c0_5 = arith.constant 0 : index
    %c0_6 = arith.constant 0 : index
    %c0_7 = arith.constant 0 : index
    %c0_8 = arith.constant 0 : index
    %7 = vector.load %arg3[%c0_5, %c0_6, %c0_7, %c0_8] : memref<2x1x8x32xbf16, #tpu.memory_space<vmem>>, vector<2x1x8x32xbf16>
    %8 = vector.shape_cast %7 : vector<2x1x8x32xbf16> to vector<2x8x32xbf16>
    %9 = arith.extf %8 : vector<2x8x32xbf16> to vector<2x8x32xf32>
    %10 = arith.subf %6, %9 : vector<2x8x32xf32>
    %11 = math.absf %10 : vector<2x8x32xf32>
    %c0_9 = arith.constant 0 : index
    %c0_10 = arith.constant 0 : index
    %c0_11 = arith.constant 0 : index
    %12 = vector.load %arg6[%c0_9, %c0_10, %c0_11] : memref<2x8x1xf32, #tpu.memory_space<vmem>>, vector<2x8x1xf32>
    %cst = arith.constant dense<0.000000e+00> : vector<2x8xf32>
    %13 = vector.multi_reduction <add>, %11, %cst [2] : vector<2x8x32xf32> to vector<2x8xf32>
    %14 = vector.shape_cast %13 : vector<2x8xf32> to vector<2x8x1xf32>
    %15 = arith.addf %12, %14 : vector<2x8x1xf32>
    %c0_12 = arith.constant 0 : index
    %c0_13 = arith.constant 0 : index
    %c0_14 = arith.constant 0 : index
    %16 = vector.load %arg6[%c0_12, %c0_13, %c0_14] : memref<2x8x1xf32, #tpu.memory_space<vmem>>, vector<2x8x1xf32>
    tpu.vector_store %arg6[%c0_12, %c0_13, %c0_14], %15 {strides = array<i32>} : memref<2x8x1xf32, #tpu.memory_space<vmem>>, vector<2x8x1xf32>,
    %17 = arith.mulf %6, %9 : vector<2x8x32xf32>
    %cst_15 = arith.constant dense<0.000000e+00> : vector<2x8xf32>
    %18 = vector.multi_reduction <add>, %17, %cst_15 [2] : vector<2x8x32xf32> to vector<2x8xf32>
    %19 = vector.shape_cast %18 : vector<2x8xf32> to vector<2x8x1xf32>
    %20 = arith.mulf %6, %6 : vector<2x8x32xf32>
    %cst_16 = arith.constant dense<0.000000e+00> : vector<2x8xf32>
    %21 = vector.multi_reduction <add>, %20, %cst_16 [2] : vector<2x8x32xf32> to vector<2x8xf32>
    %22 = vector.shape_cast %21 : vector<2x8xf32> to vector<2x8x1xf32>
    %23 = arith.mulf %9, %9 : vector<2x8x32xf32>
    %cst_17 = arith.constant dense<0.000000e+00> : vector<2x8xf32>
    %24 = vector.multi_reduction <add>, %23, %cst_17 [2] : vector<2x8x32xf32> to vector<2x8xf32>
    %25 = vector.shape_cast %24 : vector<2x8xf32> to vector<2x8x1xf32>
    %26 = arith.mulf %22, %25 : vector<2x8x1xf32>
    %cst_18 = arith.constant 1.000000e-16 : f32
    %27 = vector.broadcast %cst_18 : f32 to vector<2x8x1xf32>
    %28 = arith.maximumf %26, %27 : vector<2x8x1xf32>
    %29 = math.rsqrt %28 : vector<2x8x1xf32>
    %30 = arith.mulf %19, %29 : vector<2x8x1xf32>
    %cst_19 = arith.constant 0.000000e+00 : f32
    %31 = vector.broadcast %cst_19 : f32 to vector<2x8x1xf32>
    %32 = arith.subf %31, %30 : vector<2x8x1xf32>
    %33 = math.exp %32 : vector<2x8x1xf32>
    %34 = math.log1p %33 : vector<2x8x1xf32>
    %c0_20 = arith.constant 0 : index
    %c0_21 = arith.constant 0 : index
    %c0_22 = arith.constant 0 : index
    %35 = vector.load %arg7[%c0_20, %c0_21, %c0_22] : memref<2x8x1xf32, #tpu.memory_space<vmem>>, vector<2x8x1xf32>
    %36 = arith.addf %35, %34 : vector<2x8x1xf32>
    %c0_23 = arith.constant 0 : index
    %c0_24 = arith.constant 0 : index
    %c0_25 = arith.constant 0 : index
    %37 = vector.load %arg7[%c0_23, %c0_24, %c0_25] : memref<2x8x1xf32, #tpu.memory_space<vmem>>, vector<2x8x1xf32>
    tpu.vector_store %arg7[%c0_23, %c0_24, %c0_25], %36 {strides = array<i32>} : memref<2x8x1xf32, #tpu.memory_space<vmem>>, vector<2x8x1xf32>,
    %38 = arith.extui %1 : i1 to i32
    %c0_i32_26 = arith.constant 0 : i32
    %39 = arith.cmpi ne, %38, %c0_i32_26 : i32
    scf.if %39 {
      %c0_27 = arith.constant 0 : index
      %c0_28 = arith.constant 0 : index
      %c0_29 = arith.constant 0 : index
      %40 = vector.load %arg6[%c0_27, %c0_28, %c0_29] : memref<2x8x1xf32, #tpu.memory_space<vmem>>, vector<2x8x1xf32>
      %41 = vector.shape_cast %40 : vector<2x8x1xf32> to vector<1x2x8x1xf32>
      %cst_30 = arith.constant dense<0.000000e+00> : vector<1xf32>
      %42 = vector.multi_reduction <add>, %41, %cst_30 [1, 2, 3] : vector<1x2x8x1xf32> to vector<1xf32>
      %43 = vector.shape_cast %42 : vector<1xf32> to vector<1x1x1x1xf32>
      %44 = vector.extract %43[0, 0, 0, 0] : f32 from vector<1x1x1x1xf32>
      %cst_31 = arith.constant 0.001953125 : f32
      %45 = arith.mulf %44, %cst_31 : f32
      %c0_32 = arith.constant 0 : index
      %c0_33 = arith.constant 0 : index
      %c0_34 = arith.constant 0 : index
      %46 = vector.load %arg7[%c0_32, %c0_33, %c0_34] : memref<2x8x1xf32, #tpu.memory_space<vmem>>, vector<2x8x1xf32>
      %47 = vector.shape_cast %46 : vector<2x8x1xf32> to vector<1x2x8x1xf32>
      %cst_35 = arith.constant dense<0.000000e+00> : vector<1xf32>
      %48 = vector.multi_reduction <add>, %47, %cst_35 [1, 2, 3] : vector<1x2x8x1xf32> to vector<1xf32>
      %49 = vector.shape_cast %48 : vector<1xf32> to vector<1x1x1x1xf32>
      %50 = vector.extract %49[0, 0, 0, 0] : f32 from vector<1x1x1x1xf32>
      %cst_36 = arith.constant 6.250000e-02 : f32
      %51 = arith.mulf %50, %cst_36 : f32
      %52 = vector.broadcast %45 : f32 to vector<1x8x128xf32>
      %c0_37 = arith.constant 0 : index
      %c0_38 = arith.constant 0 : index
      %c0_39 = arith.constant 0 : index
      %53 = vector.load %arg4[%c0_37, %c0_38, %c0_39] : memref<1x8x128xf32, #tpu.memory_space<vmem>>, vector<1x8x128xf32>
      tpu.vector_store %arg4[%c0_37, %c0_38, %c0_39], %52 {strides = array<i32>} : memref<1x8x128xf32, #tpu.memory_space<vmem>>, vector<1x8x128xf32>,
      %54 = vector.broadcast %51 : f32 to vector<1x8x128xf32>
      %c0_40 = arith.constant 0 : index
      %c0_41 = arith.constant 0 : index
      %c0_42 = arith.constant 0 : index
      %55 = vector.load %arg5[%c0_40, %c0_41, %c0_42] : memref<1x8x128xf32, #tpu.memory_space<vmem>>, vector<1x8x128xf32>
      tpu.vector_store %arg5[%c0_40, %c0_41, %c0_42], %54 {strides = array<i32>} : memref<1x8x128xf32, #tpu.memory_space<vmem>>, vector<1x8x128xf32>,
    } else {
    }
    return
  }
  func.func @transform_0(%arg0: i32, %arg1: i32) -> (i32, i32, i32, i32) {
    %c0_i32 = arith.constant 0 : i32
    %c0_i32_0 = arith.constant 0 : i32
    %c0_i32_1 = arith.constant 0 : i32
    return %c0_i32, %arg0, %arg1, %c0_i32_0 : i32, i32, i32, i32
  }
  func.func @transform_1(%arg0: i32, %arg1: i32) -> (i32, i32, i32, i32) {
    %c0_i32 = arith.constant 0 : i32
    %c0_i32_0 = arith.constant 0 : i32
    %c0_i32_1 = arith.constant 0 : i32
    return %c0_i32, %arg0, %arg1, %c0_i32_0 : i32, i32, i32, i32
  }
  func.func @transform_2(%arg0: i32, %arg1: i32) -> (i32, i32, i32) {
    %c0_i32 = arith.constant 0 : i32
    %c0_i32_0 = arith.constant 0 : i32
    %c0_i32_1 = arith.constant 0 : i32
    return %arg0, %c0_i32, %c0_i32_0 : i32, i32, i32
  }
  func.func @transform_3(%arg0: i32, %arg1: i32) -> (i32, i32, i32) {
    %c0_i32 = arith.constant 0 : i32
    %c0_i32_0 = arith.constant 0 : i32
    %c0_i32_1 = arith.constant 0 : i32
    return %arg0, %c0_i32, %c0_i32_0 : i32, i32, i32
  }
}

</mosaic_0001>

<bundles_post_ra>
// kernel: tpu_custom_call.1
= control target key start
LH: loop header
LB: loop body
LE: loop exit
PB: predicated region body
PF: predicated region fallthrough
CT: control target
= control target key end

     0   :  { %s1087_s0 = inlined_call_operand.hbm [shape: bf16[2,2,8,32], index: 0, kind: input, shape index: {}]   ;;  %s1088_s1 = inlined_call_operand.hbm [shape: bf16[2,2,8,32], index: 1, kind: input, shape index: {}]   ;;  %s1089_s2 = inlined_call_operand.hbm [shape: f32[2,8,128], index: 2, kind: output, shape index: {0}]   ;;  %s1090_s3 = inlined_call_operand.hbm [shape: f32[2,8,128], index: 3, kind: output, shape index: {1}]  }
   0x1   :  { %1092 = sst [smem:[#allocation17_spill]] %s1087_s0 }
   0x2   :  { %9 = vsyncpa [#allocation5], 0 }
   0x3   :  { %11 = vsyncpa [#allocation5 + $0x1], 0 }
   0x4   :  { %12 = vsyncpa [#allocation8], 0 }
   0x5   :  { %14 = vsyncpa [#allocation8 + $0x1], 0 }
   0x6   :  { %15 = vsyncpa [#allocation6], 0 }
   0x7   :  { %17 = vsyncpa [#allocation6 + $0x1], 0 }
   0x8   :  { %18 = vsyncpa [#allocation11], 0 }
   0x9   :  { %20 = vsyncpa [#allocation11 + $0x1], 0  ;;  %s906_s12 = smov 0   ;;  %s908_s13 = smov 0  }
   0xa   :  { %s910_s14 = smov 0   ;;  %s912_s15 = smov 0  }
   0xb   :  { %s914_s16 = smov 0   ;;  %s916_s17 = smov 0  }
   0xc LB: > { %s583_s18 = sadd.s32 4294967295, %s880_s17   ;;  %s584_s19 = sadd.s32 4294967294, %s880_s17   ;;  %s880_s17 = sphi %s916_s17, %s26_s17   ;;  %s876_s16 = sphi %s914_s16, %s1105_s16   ;;  %s872_s15 = sphi %s912_s15, %s1104_s15   ;;  %s868_s14 = sphi %s910_s14, %s1103_s14   ;;  %s864_s13 = sphi %s908_s13, %s1102_s13   ;;  %s860_s12 = sphi %s906_s12, %s1101_s12  }
   0xd   : > { %s38_s20 = sadd.s32 1, %s876_s16  ;;  %s47_s21 = sadd.s32 1, %s868_s14 }
   0xe   : > { %p40_p0 = scmp.ge.s32.totalorder %s38_s20, 2  ;;  %p54_p1 = scmp.ne.s32.totalorder %s868_s14, %s864_s13 }
   0xf   : > { %p55_p2 = scmp.eq.s32.totalorder %s880_s17, 0  ;;  %p60_p3 = scmp.ne.s32.totalorder %s864_s13, %s860_s12 }
  0x10   : > { %s1107_s20 = smov (%p40_p0, %s38_s20), 0  ;;  %p61_p5 = scmp.eq.s32.totalorder %s583_s18, 0 }
  0x11   : > { %1093 = sst [smem:[#allocation16_spill]] %s1107_s20  ;;  %p947_p4 = por %p55_p2, %p54_p1 }
  0x12   : > { %s42_s23 = ssub.s32 %s876_s16, %s1107_s20  ;;  %p112_p6 = scmp.eq.s32.totalorder %s583_s18, 1 }
  0x13   : > { %p45_p7 = scmp.eq.s32.totalorder %s42_s23, 0  ;;  %p953_p8 = por %p61_p5, %p60_p3 }
  0x14   : > { %p957_p9 = por %p112_p6, %p54_p1  ;;  %p118_p10 = scmp.eq.s32.totalorder %s584_s19, 1 }
  0x15   : > { %s962_s26 = scalar_select %p45_p7, %s868_s14, %s47_s21  }
  0x16   : > { %p964_p11 = por %p118_p10, %p60_p3  ;;  %p586_p12 = scmp.ge.s32.totalorder %s880_s17, 2 }
  0x17   : > { %p636_p13 = scmp.lt.s32.totalorder %s880_s17, 2  ;;  %s971_s28 = sand.u32 1, %s868_s14  }
  0x18   : > { %s587_s29 = sshll.u32 %s971_s28, 3  ;;  %s588_s30 = sshll.u32 %s876_s16, 2 }
  0x19   : > { %s1098_s0 = sld [smem:[#allocation17_spill]]  ;;  %s168_s7 = scalar_lea.vmem [#allocation4], %s587_s29 }
  0x1a   : > { %s176_s8 = sshll.u32 %s168_s7, 4  ;;  %p980_p0 = pnand %p636_p13, %p947_p4  ;;  %s177_s8 = int_to_ptr.vmem [resolvable:$true] %s176_s8 }
  0x1b   : > { %s165_s11 = scalar_lea.sflag [#allocation5], %s971_s28  ;;  %s882_s18 = smov 128  }
  0x1c   : > { %s883_s19 = smov 64   ;;  %s884_s21 = smov 4  }
  0x1d   : > { %p591_p1 = scmp.ge.s32.totalorder %s880_s17, 1  ;;  %p206_p2 = scmp.lt.s32.totalorder %s880_s17, 3 }
  0x1e   : > { %s195_s22 = scalar_lea.hbm %s1088_s1, %s588_s30 }
  0x1f   : > { %s173_s6 = scalar_lea.hbm %s1098_s0, %s588_s30  ;;  %p207_p3 = pnand %p591_p1, %p206_p2 }
  0x20   : > { %s174_s9 = sshll.u32 %s173_s6, 4  ;;  %s196_s5 = sshll.u32 %s195_s22, 4  ;;  %s175_s9 = int_to_ptr.hbm [resolvable:$true] %s174_s9  ;;  %s197_s5 = int_to_ptr.hbm [resolvable:$true] %s196_s5 }
  0x21   : > { %625 = dma.hbm_to_vmem [thread:$0]  (!%p980_p0), %s175_s9, 128, %s177_s8, %s165_s11, %s882_s18, %s883_s19, %s884_s21  }
  0x22   : > { %s190_s6 = scalar_lea.vmem [#allocation7], %s587_s29  ;;  %s187_s0 = scalar_lea.sflag [#allocation8], %s971_s28 }
  0x23   : > { %s198_s7 = sshll.u32 %s190_s6, 4  ;;  %210 = sbr.rel (%p207_p3) target bundleno = 417 (0x1a1), region = 28  ;;  %s199_s7 = int_to_ptr.vmem [resolvable:$true] %s198_s7 }
  0x24   : > { %628 = dma.hbm_to_vmem [thread:$0]  (!%p980_p0), %s197_s5, 128, %s199_s7, %s187_s0, %s882_s18, %s883_s19, %s884_s21  }
  0x25   : > { %s996_s20 = sand.u32 (!%p207_p3), 1, %s864_s13  }
  0x26   : > { %s999_s8 = sshll.u32 (!%p207_p3), %s996_s20, 3  ;;  %s213_s9 = scalar_lea.sflag (!%p207_p3), [#allocation5], %s996_s20 }
  0x27   : > { %s216_s30 = scalar_lea.vmem (!%p207_p3), [#allocation4], %s999_s8 }
  0x28   : > { %843 = dma.done.wait (%p953_p8), %s213_s9, 128  }
  0x29   : > { %845 = vsyncadd (%p953_p8), %s213_s9, 4294967168  ;;  %s223_s0 = scalar_lea.sflag [#allocation8], %s996_s20  ;;  %s226_s28 = scalar_lea.vmem [#allocation7], %s999_s8 }
  0x2a   : > { %847 = dma.done.wait (%p953_p8), %s223_s0, 128  }
  0x2b   : > { %849 = vsyncadd (%p953_p8), %s223_s0, 4294967168  ;;  %v607_v0 = vld [vmem:[%s226_s28] sm:$0xff]   ;;  %v603_v1 = vld [vmem:[%s216_s30] sm:$0xff]   ;;  %vm283_vm0 = vcmask 261120   ;;  %vm264_vm1 = vcmask 7168   ;;  %v885_v30 = vmov 0.0  }
  0x2c   : > { %v608_v2 = vunpack.c.l.bf16 %v607_v0  ;;  %v604_v3 = vunpack.c.l.bf16 %v603_v1  ;;  %v609_v6 = vunpack.c.h.bf16 %v607_v0  ;;  %v605_v7 = vunpack.c.h.bf16 %v603_v1  ;;  %266 = vst.msk [vmem:[#allocation2 + $0x8] sm:$0xff] %vm264_vm1, %v885_v30  ;;  %s598_s24 = sshll.u32 %s872_s15, 3  ;;  %s252_s18 = scalar_lea.vmem [#allocation9], %s999_s8 }
  0x2d   : > { %267 = vst.msk [vmem:[#allocation3] sm:$0xff] %vm264_vm1, %v885_v30  ;;  %s428_s11 = scalar_lea.hbm %s1089_s2, %s598_s24  ;;  %s430_s19 = sshll.u32 %s252_s18, 4  ;;  %s431_s19 = int_to_ptr.vmem [resolvable:$true] %s430_s19 }
  0x2e   : > { %v311_v4 = vmul.f32 %v608_v2, %v608_v2  ;;  %v303_v5 = vmul.f32 %v604_v3, %v604_v3  ;;  %v295_v8 = vmul.f32 %v608_v2, %v604_v3  ;;  %v312_v12 = vmul.f32 %v609_v6, %v609_v6  ;;  %268 = vst.msk [vmem:[#allocation3 + $0x8] sm:$0xff] %vm264_vm1, %v885_v30  ;;  %s432_s21 = sshll.u32 %s428_s11, 4  ;;  %s413_s22 = scalar_lea.sflag [#allocation6], %s996_s20  ;;  %s433_s21 = int_to_ptr.hbm [resolvable:$true] %s432_s21 }
  0x2f   : > { %v304_v13 = vmul.f32 %v605_v7, %v605_v7  ;;  %v296_v14 = vmul.f32 %v609_v6, %v605_v7  ;;  %v278_v17 = vsub.f32 %v605_v7, %v609_v6  ;;  %v277_v18 = vsub.f32 %v604_v3, %v608_v2  ;;  %265 = vst.msk [vmem:[#allocation2] sm:$0xff] %vm264_vm1, %v885_v30  ;;  %s776_s5 = sshra.s32 %s433_s21, 4  ;;  %s782_s9 = scalar_lea.hbm %s1089_s2, 16  ;;  %s777_s5 = int_to_ptr.hbm [resolvable:$true] %s776_s5 }
  0x30   : > { %v313_v9 = vsel %vm283_vm0, %v311_v4, 0.0  ;;  %v305_v10 = vsel %vm283_vm0, %v303_v5, 0.0  ;;  %v297_v11 = vsel %vm283_vm0, %v295_v8, 0.0  ;;  %v316_v15 = vsel %vm283_vm0, %v312_v12, 0.0  ;;  %s778_s6 = scalar_lea.hbm %s777_s5, 8  ;;  %p783_p7 = scmp.lt.s32.totalorder %s777_s5, %s1089_s2 }
  0x31   : > { %314 = vadd.xlane.f32.xlu1 %v313_v9  ;;  %306 = vadd.xlane.f32.xlu0 %v305_v10  ;;  %v308_v16 = vsel %vm283_vm0, %v304_v13, 0.0  ;;  %v300_v19 = vsel %vm283_vm0, %v296_v14, 0.0  ;;  %v280_v20 = vand.u32 2147483647, %v278_v17  ;;  %v279_v21 = vand.u32 2147483647, %v277_v18  ;;  %p779_p4 = scmp.ne.s32.totalorder %s777_s5, %s778_s6  ;;  %p784_p8 = scmp.lt.s32.totalorder %s782_s9, %s778_s6 }
  0x32   : > { %298 = vadd.xlane.f32.xlu2 %v297_v11 }
  0x33   : > { %v287_v22 = vsel %vm283_vm0, %v280_v20, 0.0  ;;  %v284_v23 = vsel %vm283_vm0, %v279_v21, 0.0  ;;  %v282_v38 = vld [vmem:[#allocation2 + $0x8] sm:$0xff]  ;;  %p780_p5 = pnand %p779_p4, %p957_p9  ;;  %p785_p10 = por %p784_p8, %p783_p7 }
  0x34   : > { %v369_v13 = vld [vmem:[#allocation3] sm:$0xff] }
  0x35   : > { %v370_v21 = vld [vmem:[#allocation3 + $0x8] sm:$0xff]  ;;  %p781_p6 = pneg %p780_p5 }
  0x36   : > { %v281_v43 = vld [vmem:[#allocation2] sm:$0xff] }
  0x37   : > { %p786_p13 = pnand %p785_p10, %p781_p6 }
  0x39   : > { %317 = vadd.xlane.f32.xlu1 %v316_v15  ;;  %309 = vadd.xlane.f32.xlu0 %v308_v16 }
  0x3a   : > { %301 = vadd.xlane.f32.xlu2 %v300_v19 }
  0x41   : > { %288 = vadd.xlane.f32.xlu1 %v287_v22  ;;  %285 = vadd.xlane.f32.xlu0 %v284_v23 }
  0xa4   : > { %v315_v24 = vpop.xlane.xlu1 %314  ;;  %v307_v25 = vpop.xlane.xlu0 %306 }
  0xa5   : > { %v319_v26 = vmul.f32 %v315_v24, %v307_v25  ;;  %v299_v41 = vpop.xlane.xlu2 %298 }
  0xa7   : > { %v321_v27 = vmax.f32 %v319_v26, 1e-16 }
  0xa9   : > { %690 = vrsqrt.f32 %v321_v27  ;;  %vm329_vm3 = vweird.f32 %v321_v27 }
  0xac   : > { %v318_v28 = vpop.xlane.xlu1 %317  ;;  %v310_v29 = vpop.xlane.xlu0 %309 }
  0xad   : > { %v320_v31 = vmul.f32 %v318_v28, %v310_v29  ;;  %v302_v57 = vpop.xlane.xlu2 %301 }
  0xaf   : > { %v691_v32 = vpop.eup %690  ;;  %v322_v33 = vmax.f32 %v320_v31, 1e-16 }
  0xb0   : > { %v324_v34 = vmul.f32 %v691_v32, %v321_v27  ;;  %vm330_vm2 = vweird.f32 %v691_v32 }
  0xb1   : > { %692 = vrsqrt.f32 %v322_v33  ;;  %vm331_vm4 = vmor %vm329_vm3, %vm330_vm2  ;;  %vm339_vm6 = vweird.f32 %v322_v33 }
  0xb2   : > { %v325_v35 = vmul.f32 %v691_v32, %v324_v34 }
  0xb4   : > { %v326_v36 = vmul.f32 0.5, %v325_v35  ;;  %v289_v37 = vpop.xlane.xlu1 %288  ;;  %v286_v39 = vpop.xlane.xlu0 %285 }
  0xb5   : > { %v291_v42 = vadd.f32 %v289_v37, %v282_v38  ;;  %v290_v45 = vadd.f32 %v286_v39, %v281_v43 }
  0xb6   : > { %v327_v40 = vsub.f32 1.5, %v326_v36 }
  0xb7   : > { %v693_v44 = vpop.eup %692  ;;  %294 = vst.msk [vmem:[#allocation2 + $0x8] sm:$0xff] %vm264_vm1, %v291_v42 }
  0xb8   : > { %v334_v46 = vmul.f32 %v693_v44, %v322_v33  ;;  %v328_v47 = vmul.f32 %v691_v32, %v327_v40  ;;  %293 = vst.msk [vmem:[#allocation2] sm:$0xff] %vm264_vm1, %v290_v45  ;;  %vm340_vm5 = vweird.f32 %v693_v44 }
  0xb9   : > { %vm341_vm7 = vmor %vm339_vm6, %vm340_vm5 }
  0xba   : > { %v335_v48 = vmul.f32 %v693_v44, %v334_v46  ;;  %v332_v49 = vsel %vm331_vm4, %v691_v32, %v328_v47 }
  0xbb   : > { %v343_v50 = vmul.f32 %v332_v49, %v299_v41 }
  0xbc   : > { %v336_v51 = vmul.f32 0.5, %v335_v48 }
  0xbd   : > { %v345_v52 = vsub.f32 0.0, %v343_v50 }
  0xbe   : > { %v337_v53 = vsub.f32 1.5, %v336_v51  ;;  %v379_v55 = vld [vmem:[#allocation2 + $0x8] sm:$0xff] }
  0xbf   : > { %v347_v54 = vmul.f32 1.442695, %v345_v52  ;;  %v378_v58 = vld [vmem:[#allocation2] sm:$0xff]  ;;  %v381_v59 = vsel %vm264_vm1, %v379_v55, 0.0 }
  0xc0   : > { %v338_v56 = vmul.f32 %v693_v44, %v337_v53  ;;  %v380_v60 = vsel %vm264_vm1, %v378_v58, 0.0 }
  0xc1   : > { %694 = vpow2.f32 %v347_v54  ;;  %v382_v62 = vadd.f32 %v381_v59, %v380_v60 }
  0xc2   : > { %v342_v61 = vsel %vm341_vm7, %v693_v44, %v338_v56 }
  0xc3   : > { %v344_v63 = vmul.f32 %v342_v61, %v302_v57  ;;  %383 = vadd.xlane.f32.xlu2 %v382_v62 }
  0xc5   : > { %v346_v0 = vsub.f32 0.0, %v344_v63 }
  0xc7   : > { %v695_v1 = vpop.eup %694  ;;  %v349_v2 = vmul.f32 1.442695, %v346_v0 }
  0xc8   : > { %v351_v3 = vadd.f32 1.0, %v695_v1  ;;  %v354_v4 = vmul.f32 -0.5, %v695_v1  ;;  %v357_v6 = vand.u32 2147483647, %v695_v1 }
  0xc9   : > { %696 = vpow2.f32 %v349_v2 }
  0xca   : > { %698 = vlog2.f32 %v351_v3  ;;  %v355_v5 = vadd.f32 1.0, %v354_v4  ;;  %vm358_vm8 = vcmp.lt.f32.partialorder %v357_v6, 0.0004427343 }
  0xcc   : > { %v356_v11 = vmul.f32 %v695_v1, %v355_v5 }
  0xcf   : > { %v697_v7 = vpop.eup %696 }
  0xd0   : > { %v699_v8 = vpop.eup %698  ;;  %v360_v9 = vadd.f32 1.0, %v697_v7  ;;  %v363_v12 = vmul.f32 -0.5, %v697_v7  ;;  %v366_v17 = vand.u32 2147483647, %v697_v7 }
  0xd1   : > { %v353_v10 = vmul.f32 0.6931472, %v699_v8 }
  0xd2   : > { %700 = vlog2.f32 %v360_v9  ;;  %v364_v16 = vadd.f32 1.0, %v363_v12  ;;  %vm367_vm9 = vcmp.lt.f32.partialorder %v366_v17, 0.0004427343 }
  0xd3   : > { %v359_v14 = vsel %vm358_vm8, %v356_v11, %v353_v10 }
  0xd4   : > { %v371_v15 = vadd.f32 %v369_v13, %v359_v14  ;;  %v365_v20 = vmul.f32 %v697_v7, %v364_v16 }
  0xd6   : > { %373 = vst.msk [vmem:[#allocation3] sm:$0xff] %vm264_vm1, %v371_v15 }
  0xd8   : > { %v701_v18 = vpop.eup %700 }
  0xd9   : > { %v362_v19 = vmul.f32 0.6931472, %v701_v18 }
  0xdb   : > { %v368_v22 = vsel %vm367_vm9, %v365_v20, %v362_v19 }
  0xdc   : > { %v372_v23 = vadd.f32 %v370_v21, %v368_v22 }
  0xdd   : > { %v393_v24 = vld [vmem:[#allocation3] sm:$0xff] }
  0xde   : > { %374 = vst.msk [vmem:[#allocation3 + $0x8] sm:$0xff] %vm264_vm1, %v372_v23  ;;  %v395_v26 = vsel %vm264_vm1, %v393_v24, 0.0 }
  0xe5   : > { %v394_v25 = vld [vmem:[#allocation3 + $0x8] sm:$0xff] }
  0xe6   : > { %v396_v27 = vsel %vm264_vm1, %v394_v25, 0.0 }
  0xe7   : > { %v397_v28 = vadd.f32 %v396_v27, %v395_v26 }
  0xe9   : > { %398 = vadd.xlane.f32.xlu0 %v397_v28 }
 0x136   : > { %v384_v29 = vpop.xlane.xlu2 %383 }
 0x137   : > { %v385_v30 = vrot.slane %v384_v29, 4 }
 0x139   : > { %v386_v31 = vadd.f32 %v385_v30, %v384_v29 }
 0x13b   : > { %v387_v32 = vrot.slane %v386_v31, 2 }
 0x13d   : > { %v388_v33 = vadd.f32 %v387_v32, %v386_v31 }
 0x13f   : > { %v389_v34 = vrot.slane %v388_v33, 1 }
 0x141   : > { %v390_v35 = vadd.f32 %v389_v34, %v388_v33 }
 0x143   : > { %610 = vpush %v390_v35 }
 0x15c   : > { %v399_v36 = vpop.xlane.xlu0 %398 }
 0x15d   : > { %v400_v37 = vrot.slane %v399_v36, 4 }
 0x15f   : > { %v401_v38 = vadd.f32 %v400_v37, %v399_v36 }
 0x161   : > { %v402_v39 = vrot.slane %v401_v38, 2 }
 0x163   : > { %v403_v40 = vadd.f32 %v402_v39, %v401_v38 }
 0x165   : > { %v404_v41 = vrot.slane %v403_v40, 1 }
 0x167   : > { %v405_v42 = vadd.f32 %v404_v41, %v403_v40 }
 0x169   : > { %612 = vpush %v405_v42 }
 0x174   : > { %s611_s23 = spop %610 }
 0x175   : > { %s392_s4 = smul.f32 0.001953125, %s611_s23 }
 0x177   : > { %v408_v43 = vstv %s392_s4 }
 0x178   : > { %409 = vst [vmem:[%s252_s18] sm:$0xff] %v408_v43 }
 0x179   : > { %789 = shalt.err (!%p786_p13)
}
 0x17a   : > { %618 = dma.vmem_to_hbm [thread:$0]  (%p957_p9), %s431_s19, 128, %s433_s21, %s413_s22  }
 0x17b   : > { %s442_s10 = scalar_lea.hbm %s1090_s3, %s598_s24  ;;  %s259_s11 = scalar_lea.vmem [#allocation10], %s999_s8 }
 0x17c   : > { %s444_s18 = sshll.u32 %s259_s11, 4  ;;  %s446_s23 = sshll.u32 %s442_s10, 4  ;;  %s445_s18 = int_to_ptr.vmem [resolvable:$true] %s444_s18  ;;  %s447_s23 = int_to_ptr.hbm [resolvable:$true] %s446_s23 }
 0x17d   : > { %s418_s5 = scalar_lea.sflag [#allocation11], %s996_s20  ;;  %s804_s6 = sshra.s32 %s447_s23, 4  ;;  %s805_s6 = int_to_ptr.hbm [resolvable:$true] %s804_s6 }
 0x17e   : > { %s806_s7 = scalar_lea.hbm %s805_s6, 8  ;;  %s810_s8 = scalar_lea.hbm %s1090_s3, 16 }
 0x17f   : > { %p807_p0 = scmp.ne.s32.totalorder %s805_s6, %s806_s7  ;;  %p811_p3 = scmp.lt.s32.totalorder %s805_s6, %s1090_s3 }
 0x180   : > { %p812_p4 = scmp.lt.s32.totalorder %s810_s8, %s806_s7 }
 0x181   : > { %p808_p1 = pnand %p807_p0, %p957_p9 }
 0x182   : > { %p813_p5 = por %p812_p4, %p811_p3 }
 0x183   : > { %p809_p2 = pneg %p808_p1 }
 0x185   : > { %p814_p6 = pnand %p813_p5, %p809_p2 }
 0x19a   : > { %s613_s4 = spop %612 }
 0x19b   : > { %s407_s15 = smul.f32 0.0625, %s613_s4 }
 0x19d   : > { %v410_v44 = vstv %s407_s15 }
 0x19e   : > { %411 = vst [vmem:[%s259_s11] sm:$0xff] %v410_v44 }
 0x19f   : > { %817 = shalt.err (!%p814_p6)
}
 0x1a0   : > { %619 = dma.vmem_to_hbm [thread:$0]  (%p957_p9), %s445_s18, 128, %s447_s23, %s418_s5  }
 0x1a1 PF: > { %s458_s20 = sand.u32 1, %s860_s12   ;;  %p630_p7 = pnand %p586_p12, %p964_p11 }
 0x1a2   : > { %s459_s9 = scalar_lea.sflag [#allocation6], %s458_s20 }
 0x1a3   : > { %p631_p8 = pneg %p630_p7 }
 0x1a5   : > { %851 = dma.done.wait (%p631_p8), %s459_s9, 128  }
 0x1a6   : > { %853 = vsyncadd (%p631_p8), %s459_s9, 4294967168  ;;  %s469_s30 = scalar_lea.sflag [#allocation11], %s458_s20 }
 0x1a7   : > { %855 = dma.done.wait (%p631_p8), %s469_s30, 128  }
 0x1a8   : > { %857 = vsyncadd (%p631_p8), %s469_s30, 4294967168  ;;  %s26_s17 = sadd.s32 1, %s880_s17   ;;  %s1100_s25 = sld [smem:[#allocation16_spill]] }
 0x1a9   : > { %p23_p10 = scmp.ge.s32.totalorder %s26_s17, 4   ;;  %s1101_s12 = smov %s864_s13 }
 0x1aa   : > { %s1102_s13 = smov %s868_s14  ;;  %s1103_s14 = smov %s962_s26 }
 0x1ab   : > { %s1104_s15 = smov %s876_s16  ;;  %25 = sbr.rel (!%p23_p10) target bundleno = 12 (0xc), region = 111 }
 0x1ae   : > { %s1105_s16 = smov %s1100_s25 }
 0x1b0   :  { %475 = vsyncpa [#allocation5], 1 }
 0x1b1   :  { %477 = vsyncpa [#allocation5 + $0x1], 1 }
 0x1b2   :  { %478 = vsyncpa [#allocation8], 1 }
 0x1b3   :  { %480 = vsyncpa [#allocation8 + $0x1], 1 }
 0x1b4   :  { %481 = vsyncpa [#allocation6], 1 }
 0x1b5   :  { %483 = vsyncpa [#allocation6 + $0x1], 1 }
 0x1b6   :  { %484 = vsyncpa [#allocation11], 1 }
 0x1b7   :  { %486 = vsyncpa [#allocation11 + $0x1], 1 }

</bundles_post_ra>
